<compile_context>
chip_gen: v6e
topology: v6e:2x2x1
jax: 0.10.0
libtpu: 0.0.40
codegen_flags: <defaults>
</compile_context>

<pallas_src>
import functools

import jax
import jax.numpy as jnp
from jax.experimental import pallas as pl
from jax.experimental.pallas import tpu as pltpu

LANE = 128  # pad only the *internal* (VMEM-resident) feature dims to this.
VMEM = pltpu.MemorySpace.VMEM


def _round_up(n, m):
    return ((n + m - 1) // m) * m


def _fused_autoencoder_kernel(x_ref, w1_ref, b1_ref, w2_ref, b2_ref,
                              w3_ref, b3_ref, w4_ref, b4_ref, o_ref):
    """One batch tile through enc1 -> enc2 -> dec1 -> dec2, all in VMEM.

    Matmuls run on the MXU with bf16 inputs / f32 accumulation; bias-add and
    ReLU epilogues stay in f32 vregs (VPU — v5e has no bf16 VPU path).
    Intermediates are cast to bf16 only as MXU inputs for the next layer.
    Note: bf16 matmul inputs deviate from strict f32 nn.Linear semantics at
    ~1e-2 level (standard TPU practice; validated against a bf16-mirrored
    reference below).
    """
    x = x_ref[...].astype(jnp.bfloat16)  # (tb, d_in): in-kernel cast, no wrapper pad

    # encoder layer 1: Linear + ReLU
    h = jnp.dot(x, w1_ref[...], preferred_element_type=jnp.float32)
    h = jnp.maximum(h + b1_ref[...], 0.0)

    # encoder layer 2: Linear  (latent z)
    z = jnp.dot(h.astype(jnp.bfloat16), w2_ref[...],
                preferred_element_type=jnp.float32)
    z = z + b2_ref[...]

    # decoder layer 1: Linear + ReLU
    h2 = jnp.dot(z.astype(jnp.bfloat16), w3_ref[...],
                 preferred_element_type=jnp.float32)
    h2 = jnp.maximum(h2 + b3_ref[...], 0.0)

    # decoder layer 2: Linear (reconstruction) — only d_in valid lanes stored.
    y = jnp.dot(h2.astype(jnp.bfloat16), w4_ref[...],
                preferred_element_type=jnp.float32)
    o_ref[...] = (y + b4_ref[...]).astype(o_ref.dtype)


def init_params(key, d_in, d_hidden, d_latent, dtype=jnp.float32):
    """Deterministic synthetic parameters (matching nn.Linear init/shapes).

    Weights are stored (in_features, out_features) so y = x @ W + b matches
    torch's x @ W.T with W of shape (out, in).
    """
    keys = jax.random.split(key, 8)

    def lin(kw, kb, fan_in, fan_out):
        lim = 1.0 / jnp.sqrt(jnp.asarray(fan_in, jnp.float32))
        w = jax.random.uniform(kw, (fan_in, fan_out), dtype, -lim, lim)
        b = jax.random.uniform(kb, (fan_out,), dtype, -lim, lim)
        return w, b

    return {
        "enc1": lin(keys[0], keys[1], d_in, d_hidden),
        "enc2": lin(keys[2], keys[3], d_hidden, d_latent),
        "dec1": lin(keys[4], keys[5], d_latent, d_hidden),
        "dec2": lin(keys[6], keys[7], d_hidden, d_in),
    }


def pad_params(params):
    """Prepare weights/biases ONCE, at init.

    Only the internal hidden/latent dims are zero-padded to 128 lanes (they
    live purely in VMEM); w1's input dim and w4's output dim stay at d_in so
    x and y can stream to/from HBM at their true width. Zero padding is
    exact: padded rows/cols contribute nothing. Weights -> bf16 (MXU inputs,
    halves resident VMEM), biases -> (1, P) f32 rows (f32 epilogue).
    """
    def pad_w(w, pad_in=True, pad_out=True):
        pi = _round_up(w.shape[0], LANE) if pad_in else w.shape[0]
        po = _round_up(w.shape[1], LANE) if pad_out else w.shape[1]
        wp = jnp.pad(w, ((0, pi - w.shape[0]), (0, po - w.shape[1])))
        return wp.astype(jnp.bfloat16)

    def pad_b(b, pad=True):
        po = _round_up(b.shape[0], LANE) if pad else b.shape[0]
        return jnp.pad(b, (0, po - b.shape[0])).reshape(1, po).astype(jnp.float32)

    w1, b1 = params["enc1"]
    w2, b2 = params["enc2"]
    w3, b3 = params["dec1"]
    w4, b4 = params["dec2"]
    return (pad_w(w1, pad_in=False), pad_b(b1),   # enc1: K = d_in unpadded
            pad_w(w2), pad_b(b2),                 # enc2
            pad_w(w3), pad_b(b3),                 # dec1
            pad_w(w4, pad_out=False), pad_b(b4, pad=False))  # dec2: N = d_in unpadded


def autoencoder_forward(padded_params, x, *, tb=None):
    """Fused 4-layer autoencoder forward as a single Pallas call.

    x: (B, d_in) f32. Returns (B, d_in) f32.
    """
    w1, b1, w2, b2, w3, b3, w4, b4 = padded_params
    B, d_in = x.shape
    p_h = w1.shape[1]             # padded hidden width
    p_z = w2.shape[1]             # padded latent width

    if tb is None:
        # >= 2 balanced grid steps when possible (v7x 2-TC split), capped at
        # 1024 rows/step (well under scoped VMEM), 8-row sublane aligned.
        tb = max(8, min(1024, _round_up(pl.cdiv(B, 2), 8)))
    grid = (pl.cdiv(B, tb),)

    # Advisory cost hint (actual executed padded problem).
    bp = grid[0] * tb
    flops = 2 * bp * (d_in * p_h + p_h * p_z + p_z * p_h + p_h * d_in)
    bytes_accessed = (
        B * d_in * 4                                          # f32 acts in
        + B * d_in * 4                                        # f32 out
        + (w1.size + w2.size + w3.size + w4.size) * 2         # bf16 weights
        + (b1.size + b2.size + b3.size + b4.size) * 4)        # f32 biases

    # Weights/biases use a constant index_map -> stay resident in VMEM across
    # the whole batch grid; only the activation tile streams per step.
    resident = lambda shape: pl.BlockSpec(shape, lambda i: (0, 0),
                                          memory_space=VMEM)

    return pl.pallas_call(
        _fused_autoencoder_kernel,
        out_shape=jax.ShapeDtypeStruct((B, d_in), jnp.float32),
        grid=grid,
        in_specs=[
            # x: f32, full (unpadded) feature width — last dim equals the full
            # array dim so the (8,128) rule is satisfied.
            pl.BlockSpec((tb, d_in), lambda i: (i, 0), memory_space=VMEM),
            resident((d_in, p_h)), resident((1, p_h)),   # enc1 W, b
            resident((p_h, p_z)), resident((1, p_z)),    # enc2 W, b
            resident((p_z, p_h)), resident((1, p_h)),    # dec1 W, b
            resident((p_h, d_in)), resident((1, d_in)),  # dec2 W, b
        ],
        # Output written directly at its true width -> no post-call slice.
        out_specs=pl.BlockSpec((tb, d_in), lambda i: (i, 0),
                               memory_space=VMEM),
        compiler_params=pltpu.CompilerParams(
            # Batch tiles are independent -> shard across v7x's 2 TensorCores
            # (harmless no-op on single-TC v5e/v6e).
            dimension_semantics=("parallel",),
        ),
        cost_estimate=pl.CostEstimate(flops=flops, transcendentals=0,
                                      bytes_accessed=bytes_accessed),
    )(x, w1, b1, w2, b2, w3, b3, w4, b4)


def autoencoder_ref(params, x):
    """Pure-JAX reference mirroring the kernel's bf16-input / f32-acc math."""
    def lin(a, w, b):
        return jnp.dot(a.astype(jnp.bfloat16), w.astype(jnp.bfloat16),
                       preferred_element_type=jnp.float32) + b

    h = jnp.maximum(lin(x, *params["enc1"]), 0.0)
    z = lin(h, *params["enc2"])
    h2 = jnp.maximum(lin(z, *params["dec1"]), 0.0)
    return lin(h2, *params["dec2"])


if __name__ == "__main__":
    # Small shapes consistent with the module; batch chosen so the adaptive
    # tile gives a 2-step "parallel" grid (exercises batch tiling / v7x split).
    B, D_IN, D_HIDDEN, D_LATENT = 256, 64, 32, 16

    key = jax.random.PRNGKey(0)
    k_params, k_x = jax.random.split(key)
    params = init_params(k_params, D_IN, D_HIDDEN, D_LATENT)
    padded_params = pad_params(params)
    x = jax.random.normal(k_x, (B, D_IN), jnp.float32)

    fwd = jax.jit(functools.partial(autoencoder_forward))
    y = fwd(padded_params, x)
    y = jax.block_until_ready(y)

    y_ref = autoencoder_ref(params, x)
    assert y.shape == (B, D_IN)
    max_err = float(jnp.max(jnp.abs(y - y_ref)))
    assert jnp.allclose(y, y_ref, atol=1e-2, rtol=1e-2), (
        f"mismatch vs reference (max abs err {max_err})")

    print("KERNEL_OK")
</pallas_src>

<mosaic_0001>
module attributes {stable_mosaic.version = 11 : i64} {
  func.func @_fused_autoencoder_kernel(%arg0: i32, %arg1: memref<128x64xf32, #tpu.memory_space<vmem>>, %arg2: memref<64x128xbf16, #tpu.memory_space<vmem>>, %arg3: memref<1x128xf32, #tpu.memory_space<vmem>>, %arg4: memref<128x128xbf16, #tpu.memory_space<vmem>>, %arg5: memref<1x128xf32, #tpu.memory_space<vmem>>, %arg6: memref<128x128xbf16, #tpu.memory_space<vmem>>, %arg7: memref<1x128xf32, #tpu.memory_space<vmem>>, %arg8: memref<128x64xbf16, #tpu.memory_space<vmem>>, %arg9: memref<1x64xf32, #tpu.memory_space<vmem>>, %arg10: memref<128x64xf32, #tpu.memory_space<vmem>>) attributes {dimension_semantics = [#tpu.dimension_semantics<parallel>], iteration_bounds = array<i64: 2>, scalar_prefetch = 0 : i64, scratch_operands = 0 : i64, tpu.core_type = #tpu.core_type<tc>, window_params = [{transform_indices = @transform_0, window_bounds = array<i64: 128, 64>}, {pipeline_mode = #tpu.pipeline_mode<synchronous>, transform_indices = @transform_1, window_bounds = array<i64: 64, 128>}, {pipeline_mode = #tpu.pipeline_mode<synchronous>, transform_indices = @transform_2, window_bounds = array<i64: 1, 128>}, {pipeline_mode = #tpu.pipeline_mode<synchronous>, transform_indices = @transform_3, window_bounds = array<i64: 128, 128>}, {pipeline_mode = #tpu.pipeline_mode<synchronous>, transform_indices = @transform_4, window_bounds = array<i64: 1, 128>}, {pipeline_mode = #tpu.pipeline_mode<synchronous>, transform_indices = @transform_5, window_bounds = array<i64: 128, 128>}, {pipeline_mode = #tpu.pipeline_mode<synchronous>, transform_indices = @transform_6, window_bounds = array<i64: 1, 128>}, {pipeline_mode = #tpu.pipeline_mode<synchronous>, transform_indices = @transform_7, window_bounds = array<i64: 128, 64>}, {pipeline_mode = #tpu.pipeline_mode<synchronous>, transform_indices = @transform_8, window_bounds = array<i64: 1, 64>}, {transform_indices = @transform_9, window_bounds = array<i64: 128, 64>}]} {
    %c0 = arith.constant 0 : index
    %c0_0 = arith.constant 0 : index
    %0 = vector.load %arg1[%c0, %c0_0] : memref<128x64xf32, #tpu.memory_space<vmem>>, vector<128x64xf32>
    %1 = arith.truncf %0 : vector<128x64xf32> to vector<128x64xbf16>
    %c0_1 = arith.constant 0 : index
    %c0_2 = arith.constant 0 : index
    %2 = vector.load %arg2[%c0_1, %c0_2] : memref<64x128xbf16, #tpu.memory_space<vmem>>, vector<64x128xbf16>
    %cst = arith.constant dense<0.000000e+00> : vector<128x128xf32>
    %3 = tpu.matmul %1, %2, %cst {dimension_numbers = #tpu.dot_dimension_numbers<[1], [0], [0], [1], [0, 0, 1, 1], [], []>} : vector<128x64xbf16>, vector<64x128xbf16>, vector<128x128xf32> -> vector<128x128xf32>
    %c0_3 = arith.constant 0 : index
    %c0_4 = arith.constant 0 : index
    %4 = vector.load %arg3[%c0_3, %c0_4] : memref<1x128xf32, #tpu.memory_space<vmem>>, vector<1x128xf32>
    %5 = vector.broadcast %4 : vector<1x128xf32> to vector<128x128xf32>
    %6 = arith.addf %3, %5 : vector<128x128xf32>
    %cst_5 = arith.constant 0.000000e+00 : f32
    %7 = vector.broadcast %cst_5 : f32 to vector<128x128xf32>
    %8 = arith.maximumf %6, %7 : vector<128x128xf32>
    %9 = arith.truncf %8 : vector<128x128xf32> to vector<128x128xbf16>
    %c0_6 = arith.constant 0 : index
    %c0_7 = arith.constant 0 : index
    %10 = vector.load %arg4[%c0_6, %c0_7] : memref<128x128xbf16, #tpu.memory_space<vmem>>, vector<128x128xbf16>
    %cst_8 = arith.constant dense<0.000000e+00> : vector<128x128xf32>
    %11 = tpu.matmul %9, %10, %cst_8 {dimension_numbers = #tpu.dot_dimension_numbers<[1], [0], [0], [1], [0, 0, 1, 1], [], []>} : vector<128x128xbf16>, vector<128x128xbf16>, vector<128x128xf32> -> vector<128x128xf32>
    %c0_9 = arith.constant 0 : index
    %c0_10 = arith.constant 0 : index
    %12 = vector.load %arg5[%c0_9, %c0_10] : memref<1x128xf32, #tpu.memory_space<vmem>>, vector<1x128xf32>
    %13 = vector.broadcast %12 : vector<1x128xf32> to vector<128x128xf32>
    %14 = arith.addf %11, %13 : vector<128x128xf32>
    %15 = arith.truncf %14 : vector<128x128xf32> to vector<128x128xbf16>
    %c0_11 = arith.constant 0 : index
    %c0_12 = arith.constant 0 : index
    %16 = vector.load %arg6[%c0_11, %c0_12] : memref<128x128xbf16, #tpu.memory_space<vmem>>, vector<128x128xbf16>
    %cst_13 = arith.constant dense<0.000000e+00> : vector<128x128xf32>
    %17 = tpu.matmul %15, %16, %cst_13 {dimension_numbers = #tpu.dot_dimension_numbers<[1], [0], [0], [1], [0, 0, 1, 1], [], []>} : vector<128x128xbf16>, vector<128x128xbf16>, vector<128x128xf32> -> vector<128x128xf32>
    %c0_14 = arith.constant 0 : index
    %c0_15 = arith.constant 0 : index
    %18 = vector.load %arg7[%c0_14, %c0_15] : memref<1x128xf32, #tpu.memory_space<vmem>>, vector<1x128xf32>
    %19 = vector.broadcast %18 : vector<1x128xf32> to vector<128x128xf32>
    %20 = arith.addf %17, %19 : vector<128x128xf32>
    %cst_16 = arith.constant 0.000000e+00 : f32
    %21 = vector.broadcast %cst_16 : f32 to vector<128x128xf32>
    %22 = arith.maximumf %20, %21 : vector<128x128xf32>
    %23 = arith.truncf %22 : vector<128x128xf32> to vector<128x128xbf16>
    %c0_17 = arith.constant 0 : index
    %c0_18 = arith.constant 0 : index
    %24 = vector.load %arg8[%c0_17, %c0_18] : memref<128x64xbf16, #tpu.memory_space<vmem>>, vector<128x64xbf16>
    %cst_19 = arith.constant dense<0.000000e+00> : vector<128x64xf32>
    %25 = tpu.matmul %23, %24, %cst_19 {dimension_numbers = #tpu.dot_dimension_numbers<[1], [0], [0], [1], [0, 0, 1, 1], [], []>} : vector<128x128xbf16>, vector<128x64xbf16>, vector<128x64xf32> -> vector<128x64xf32>
    %c0_20 = arith.constant 0 : index
    %c0_21 = arith.constant 0 : index
    %26 = vector.load %arg9[%c0_20, %c0_21] : memref<1x64xf32, #tpu.memory_space<vmem>>, vector<1x64xf32>
    %27 = vector.broadcast %26 : vector<1x64xf32> to vector<128x64xf32>
    %28 = arith.addf %25, %27 : vector<128x64xf32>
    %c0_22 = arith.constant 0 : index
    %c0_23 = arith.constant 0 : index
    %29 = vector.load %arg10[%c0_22, %c0_23] : memref<128x64xf32, #tpu.memory_space<vmem>>, vector<128x64xf32>
    tpu.vector_store %arg10[%c0_22, %c0_23], %28 {strides = array<i32>} : memref<128x64xf32, #tpu.memory_space<vmem>>, vector<128x64xf32>,
    return
  }
  func.func @transform_0(%arg0: i32) -> (i32, i32) {
    %c0_i32 = arith.constant 0 : i32
    %c0_i32_0 = arith.constant 0 : i32
    return %arg0, %c0_i32 : i32, i32
  }
  func.func @transform_1(%arg0: i32) -> (i32, i32) {
    %c0_i32 = arith.constant 0 : i32
    %c0_i32_0 = arith.constant 0 : i32
    %c0_i32_1 = arith.constant 0 : i32
    return %c0_i32, %c0_i32_0 : i32, i32
  }
  func.func @transform_2(%arg0: i32) -> (i32, i32) {
    %c0_i32 = arith.constant 0 : i32
    %c0_i32_0 = arith.constant 0 : i32
    %c0_i32_1 = arith.constant 0 : i32
    return %c0_i32, %c0_i32_0 : i32, i32
  }
  func.func @transform_3(%arg0: i32) -> (i32, i32) {
    %c0_i32 = arith.constant 0 : i32
    %c0_i32_0 = arith.constant 0 : i32
    %c0_i32_1 = arith.constant 0 : i32
    return %c0_i32, %c0_i32_0 : i32, i32
  }
  func.func @transform_4(%arg0: i32) -> (i32, i32) {
    %c0_i32 = arith.constant 0 : i32
    %c0_i32_0 = arith.constant 0 : i32
    %c0_i32_1 = arith.constant 0 : i32
    return %c0_i32, %c0_i32_0 : i32, i32
  }
  func.func @transform_5(%arg0: i32) -> (i32, i32) {
    %c0_i32 = arith.constant 0 : i32
    %c0_i32_0 = arith.constant 0 : i32
    %c0_i32_1 = arith.constant 0 : i32
    return %c0_i32, %c0_i32_0 : i32, i32
  }
  func.func @transform_6(%arg0: i32) -> (i32, i32) {
    %c0_i32 = arith.constant 0 : i32
    %c0_i32_0 = arith.constant 0 : i32
    %c0_i32_1 = arith.constant 0 : i32
    return %c0_i32, %c0_i32_0 : i32, i32
  }
  func.func @transform_7(%arg0: i32) -> (i32, i32) {
    %c0_i32 = arith.constant 0 : i32
    %c0_i32_0 = arith.constant 0 : i32
    %c0_i32_1 = arith.constant 0 : i32
    return %c0_i32, %c0_i32_0 : i32, i32
  }
  func.func @transform_8(%arg0: i32) -> (i32, i32) {
    %c0_i32 = arith.constant 0 : i32
    %c0_i32_0 = arith.constant 0 : i32
    %c0_i32_1 = arith.constant 0 : i32
    return %c0_i32, %c0_i32_0 : i32, i32
  }
  func.func @transform_9(%arg0: i32) -> (i32, i32) {
    %c0_i32 = arith.constant 0 : i32
    %c0_i32_0 = arith.constant 0 : i32
    return %arg0, %c0_i32 : i32, i32
  }
}

</mosaic_0001>

<bundles_post_ra>
// kernel: autoencoder_forward.1
= control target key start
LH: loop header
LB: loop body
LE: loop exit
PB: predicated region body
PF: predicated region fallthrough
CT: control target
= control target key end

     0   :  { %s1495_s30 = smov 0   ;;  %s1675_s0 = inlined_call_operand.vmem [shape: f32[256,64], index: 0, kind: input, shape index: {}]   ;;  %s1676_s1 = inlined_call_operand.vmem [shape: bf16[64,128], index: 1, kind: input, shape index: {}]   ;;  %s1677_s2 = inlined_call_operand.vmem [shape: f32[1,128], index: 2, kind: input, shape index: {}]   ;;  %s1678_s3 = inlined_call_operand.vmem [shape: bf16[128,128], index: 3, kind: input, shape index: {}]   ;;  %s1679_s4 = inlined_call_operand.vmem [shape: f32[1,128], index: 4, kind: input, shape index: {}]   ;;  %s1680_s5 = inlined_call_operand.vmem [shape: bf16[128,128], index: 5, kind: input, shape index: {}]   ;;  %s1681_s6 = inlined_call_operand.vmem [shape: f32[1,128], index: 6, kind: input, shape index: {}]   ;;  %s1682_s7 = inlined_call_operand.vmem [shape: bf16[128,64], index: 7, kind: input, shape index: {}]   ;;  %s1683_s8 = inlined_call_operand.vmem [shape: f32[1,64], index: 8, kind: input, shape index: {}]   ;;  %s1684_s9 = inlined_call_operand.vmem [shape: f32[256,64], index: 9, kind: output, shape index: {}]  }
   0x1 LB: > { %s1154_s10 = sadd.s32 4294967295, %s1443_s30   ;;  %p1158_p0 = scmp.ge.s32.totalorder %s1443_s30, 1  ;;  %s1443_s30 = sphi %s1495_s30, %s19_s30  }
   0x2   : > { %p288_p1 = scmp.lt.s32.totalorder %s1443_s30, 3 }
   0x4   : > { %p289_p2 = pnand %p1158_p0, %p288_p1 }
   0x5   : > { %s1159_s13 = sshll.u32 (!%p289_p2), %s1154_s10, 4 }
   0x6   : > { %292 = sbr.rel (%p289_p2) target bundleno = 870 (0x366), region = 56  ;;  %p325_p3 = scmp.lt.s32.totalorder (!%p289_p2), %s1159_s13, 31 }
   0xb   : > { %v1409_v0 = vld [vmem:[%s1676_s1 + $0x18] sm:$0xff]   ;;  %v1410_v1 = vld [vmem:[%s1676_s1 + $0x10] sm:$0xff]   ;;  %v1411_v2 = vld [vmem:[%s1676_s1 + $0x8] sm:$0xff]   ;;  %s1686_s13 = smov (!%p325_p3, %s1159_s13), 31  ;;  %vm400_vm0 = vcmask 523264  }
   0xc   : > { %1265 = vmatprep.subr.bf16.mxu0 %v1409_v0  ;;  %v1413_v3 = vld [vmem:[%s1678_s3 + $0x38] sm:$0xff]   ;;  %s1160_s20 = sshll.u32 %s1686_s13, 3  ;;  %v1414_v4 = vld [vmem:[%s1678_s3 + $0x30] sm:$0xff]   ;;  %v1412_v7 = vld [vmem:[%s1676_s1] sm:$0xff]  }
   0xd   : > { %1266 = vmatpush3.bf16.msra.mxu0 %v1409_v0  ;;  %s1526_s25 = scalar_lea.vmem %s1675_s0, %s1160_s20  ;;  %1289 = vmatprep.subr.bf16.mxu1 %v1413_v3  ;;  %v1415_v9 = vld [vmem:[%s1678_s3 + $0x28] sm:$0xff]   ;;  %v1416_v14 = vld [vmem:[%s1678_s3 + $0x20] sm:$0xff]   ;;  %v1417_v16 = vld [vmem:[%s1678_s3 + $0x18] sm:$0xff]   ;;  %s1638_s28 = scalar_lea.vmem %s1684_s9, %s1160_s20 }
   0xe   : > { %1267 = vmatprep.subr.bf16.mxu0 %v1410_v1  ;;  %v337_v5 = vld [vmem:[%s1526_s25] sm:$0xff]  ;;  %v338_v6 = vld [vmem:[%s1526_s25 + $0x8] sm:$0xff]  ;;  %1290 = vmatpush3.bf16.msra.mxu1 %v1413_v3  ;;  %v339_v10 = vld [vmem:[%s1526_s25 + $0x10] sm:$0xff] }
   0xf   : > { %v353_v8 = vpack.c.bf16 %v338_v6, %v337_v5  ;;  %1291 = vmatprep.subr.bf16.mxu1 %v1414_v4  ;;  %v340_v11 = vld [vmem:[%s1526_s25 + $0x18] sm:$0xff]  ;;  %v341_v12 = vld [vmem:[%s1526_s25 + $0x20] sm:$0xff]  ;;  %v342_v13 = vld [vmem:[%s1526_s25 + $0x28] sm:$0xff] }
  0x10   : > { %v354_v15 = vpack.c.bf16 %v340_v11, %v339_v10  ;;  %v355_v17 = vpack.c.bf16 %v342_v13, %v341_v12  ;;  %v343_v18 = vld [vmem:[%s1526_s25 + $0x30] sm:$0xff]  ;;  %v344_v19 = vld [vmem:[%s1526_s25 + $0x38] sm:$0xff]  ;;  %v345_v20 = vld [vmem:[%s1526_s25 + $0x40] sm:$0xff] }
  0x11   : > { %1268 = vmatpush3.bf16.msra.mxu0 %v1410_v1  ;;  %1273 = vmatprep.mubr.msk.bf16.mxu0 %vm400_vm0, %v353_v8  ;;  %v346_v21 = vld [vmem:[%s1526_s25 + $0x48] sm:$0xff]  ;;  %v356_v22 = vpack.c.bf16 %v344_v19, %v343_v18  ;;  %v347_v24 = vld [vmem:[%s1526_s25 + $0x50] sm:$0xff]  ;;  %v348_v25 = vld [vmem:[%s1526_s25 + $0x58] sm:$0xff] }
  0x12   : > { %1269 = vmatprep.subr.bf16.mxu0 %v1411_v2  ;;  %1292 = vmatpush3.bf16.msra.mxu1 %v1414_v4  ;;  %v357_v23 = vpack.c.bf16 %v346_v21, %v345_v20  ;;  %v349_v26 = vld [vmem:[%s1526_s25 + $0x60] sm:$0xff]  ;;  %v350_v27 = vld [vmem:[%s1526_s25 + $0x68] sm:$0xff]  ;;  %v358_v28 = vpack.c.bf16 %v348_v25, %v347_v24  ;;  %v351_v30 = vld [vmem:[%s1526_s25 + $0x70] sm:$0xff] }
  0x13   : > { %1293 = vmatprep.subr.bf16.mxu1 %v1415_v9  ;;  %v359_v29 = vpack.c.bf16 %v350_v27, %v349_v26  ;;  %v352_v31 = vld [vmem:[%s1526_s25 + $0x78] sm:$0xff]  ;;  %v1418_v33 = vld [vmem:[%s1678_s3 + $0x10] sm:$0xff]   ;;  %v1419_v34 = vld [vmem:[%s1678_s3 + $0x8] sm:$0xff]  }
  0x14   : > { %v360_v32 = vpack.c.bf16 %v352_v31, %v351_v30  ;;  %v1420_v35 = vld [vmem:[%s1678_s3] sm:$0xff]   ;;  %v1421_v36 = vld [vmem:[%s1680_s5 + $0x38] sm:$0xff]   ;;  %v1422_v37 = vld [vmem:[%s1680_s5 + $0x30] sm:$0xff]  }
  0x15   : > { %1270 = vmatpush3.bf16.msra.mxu0 %v1411_v2  ;;  %v1423_v38 = vld [vmem:[%s1680_s5 + $0x28] sm:$0xff]   ;;  %v1424_v39 = vld [vmem:[%s1680_s5 + $0x20] sm:$0xff]   ;;  %v1425_v40 = vld [vmem:[%s1680_s5 + $0x18] sm:$0xff]  }
  0x16   : > { %1271 = vmatprep.subr.bf16.mxu0 %v1412_v7  ;;  %1294 = vmatpush3.bf16.msra.mxu1 %v1415_v9  ;;  %v1426_v41 = vld [vmem:[%s1680_s5 + $0x10] sm:$0xff]   ;;  %v1163_v44 = vld [vmem:[%s1677_s2] ss:$0 sm:$0xff] }
  0x17   : > { %1295 = vmatprep.subr.bf16.mxu1 %v1416_v14 }
  0x19   : > { %1272 = vmatpush3.bf16.msra.mxu0 %v1412_v7 }
  0x1a   : > { %1296 = vmatpush3.bf16.msra.mxu1 %v1416_v14  ;;  %1321 = vmatprep.subr.bf16.mxu0 %v1421_v36 }
  0x1b   : > { %1297 = vmatprep.subr.bf16.mxu1 %v1417_v16 }
  0x1c   : > { %1274 = vmatmul.mubr.msk.bf16.vlgmr.msra.gmra.mxu0 %vm400_vm0, %v354_v15 }
  0x1d   : > { %1277 = vmatprep.mubr.msk.bf16.mxu0 %vm400_vm0, %v355_v17  ;;  %1322 = vmatpush3.bf16.msra.mxu0 %v1421_v36  ;;  %v1428_v36 = vld [vmem:[%s1680_s5] sm:$0xff]  }
  0x1e   : > { %1298 = vmatpush3.bf16.msra.mxu1 %v1417_v16  ;;  %1323 = vmatprep.subr.bf16.mxu0 %v1422_v37 }
  0x1f   : > { %1299 = vmatprep.subr.bf16.mxu1 %v1418_v33 }
  0x21   : > { %1324 = vmatpush3.bf16.msra.mxu0 %v1422_v37  ;;  %v1429_v37 = vld [vmem:[%s1682_s7 + $0x38] sm:$0xff]  }
  0x22   : > { %1300 = vmatpush3.bf16.msra.mxu1 %v1418_v33  ;;  %1325 = vmatprep.subr.bf16.mxu0 %v1423_v38 }
  0x23   : > { %1301 = vmatprep.subr.bf16.mxu1 %v1419_v34 }
  0x24   : > { %1278 = vmatmul.mubr.msk.bf16.gmra.mxu0 %vm400_vm0, %v356_v22 }
  0x25   : > { %1281 = vmatprep.mubr.msk.bf16.mxu0 %vm400_vm0, %v357_v23  ;;  %1326 = vmatpush3.bf16.msra.mxu0 %v1423_v38  ;;  %v1430_v38 = vld [vmem:[%s1682_s7 + $0x30] sm:$0xff]  }
  0x26   : > { %1302 = vmatpush3.bf16.msra.mxu1 %v1419_v34  ;;  %1327 = vmatprep.subr.bf16.mxu0 %v1424_v39 }
  0x27   : > { %1303 = vmatprep.subr.bf16.mxu1 %v1420_v35 }
  0x29   : > { %1328 = vmatpush3.bf16.msra.mxu0 %v1424_v39  ;;  %v1431_v39 = vld [vmem:[%s1682_s7 + $0x28] sm:$0xff]  }
  0x2a   : > { %1304 = vmatpush3.bf16.msra.mxu1 %v1420_v35  ;;  %1329 = vmatprep.subr.bf16.mxu0 %v1425_v40  ;;  %v1427_v35 = vld [vmem:[%s1680_s5 + $0x8] sm:$0xff]  }
  0x2b   : > { %1385 = vmatprep.subr.bf16.mxu1 %v1429_v37 }
  0x2c   : > { %1282 = vmatmul.mubr.msk.bf16.gmra.mxu0 %vm400_vm0, %v358_v28 }
  0x2d   : > { %1285 = vmatprep.mubr.msk.bf16.mxu0 %vm400_vm0, %v359_v29  ;;  %1330 = vmatpush3.bf16.msra.mxu0 %v1425_v40  ;;  %v1432_v40 = vld [vmem:[%s1682_s7 + $0x20] sm:$0xff]  }
  0x2e   : > { %1331 = vmatprep.subr.bf16.mxu0 %v1426_v41 }
  0x31   : > { %1332 = vmatpush3.bf16.msra.mxu0 %v1426_v41  ;;  %v1433_v41 = vld [vmem:[%s1682_s7 + $0x18] sm:$0xff]  }
  0x32   : > { %1333 = vmatprep.subr.bf16.mxu0 %v1427_v35 }
  0x34   : > { %1286 = vmatmul.mubr.msk.bf16.gmra.mxu0 %vm400_vm0, %v360_v32 }
  0x35   : > { %1334 = vmatpush3.bf16.msra.mxu0 %v1427_v35 }
  0x36   : > { %1335 = vmatprep.subr.bf16.mxu0 %v1428_v36 }
  0x39   : > { %1336 = vmatpush3.bf16.msra.mxu0 %v1428_v36 }
  0x3a   : > { %1353 = vmatprep.subr.bf16.mxu0 %v1429_v37 }
  0xdc   : > { %v1275_v42 = vpop.f32.mrf.mxu0 }
  0xdd   : > { %v468_v48 = vadd.f32 %v1275_v42, %v1163_v44 }
  0xde   : > { %v459_v43 = vpop.f32.mrf.mxu0 }
  0xdf   : > { %v460_v46 = vadd.f32 %v1163_v44, %v459_v43  ;;  %v524_v55 = vmax.f32 %v468_v48, 0.0 }
  0xe0   : > { %v1276_v45 = vpop.f32.mrf.mxu0 }
  0xe1   : > { %v471_v47 = vadd.f32 %v1276_v45, %v1163_v44  ;;  %v522_v53 = vmax.f32 %v460_v46, 0.0  ;;  %v1176_v45 = vld [vmem:[%s1679_s4] ss:$0 sm:$0xff] }
  0xe2   : > { %v462_v49 = vpop.f32.mrf.mxu0 }
  0xe3   : > { %v463_v50 = vadd.f32 %v1163_v44, %v462_v49  ;;  %v525_v51 = vmax.f32 %v471_v47, 0.0 }
  0xe4   : > { %v1279_v52 = vpop.f32.mrf.mxu0 }
  0xe5   : > { %v523_v54 = vmax.f32 %v463_v50, 0.0  ;;  %v539_v58 = vpack.c.bf16 %v525_v51, %v524_v55  ;;  %v484_v62 = vadd.f32 %v1279_v52, %v1163_v44 }
  0xe6   : > { %v475_v56 = vpop.f32.mrf.mxu0 }
  0xe7   : > { %v538_v57 = vpack.c.bf16 %v523_v54, %v522_v53  ;;  %v476_v60 = vadd.f32 %v1163_v44, %v475_v56  ;;  %v528_v5 = vmax.f32 %v484_v62, 0.0 }
  0xe8   : > { %v1280_v59 = vpop.f32.mrf.mxu0 }
  0xe9   : > { %v487_v61 = vadd.f32 %v1280_v59, %v1163_v44  ;;  %1305 = vmatprep.mubr.bf16.mxu1 %v538_v57  ;;  %v526_v3 = vmax.f32 %v476_v60, 0.0 }
  0xea   : > { %v478_v63 = vpop.f32.mrf.mxu0  ;;  %1306 = vmatmul.mubr.bf16.vlgmr.msra.gmra.mxu1 %v539_v58 }
  0xeb   : > { %v479_v0 = vadd.f32 %v1163_v44, %v478_v63  ;;  %v529_v1 = vmax.f32 %v487_v61, 0.0  ;;  %1393 = vmatpush3.bf16.msra.mxu1 %v1429_v37 }
  0xec   : > { %v1283_v2 = vpop.f32.mrf.mxu0  ;;  %1386 = vmatprep.subr.bf16.mxu1 %v1430_v38 }
  0xed   : > { %v527_v4 = vmax.f32 %v479_v0, 0.0  ;;  %v541_v8 = vpack.c.bf16 %v529_v1, %v528_v5  ;;  %v500_v12 = vadd.f32 %v1283_v2, %v1163_v44 }
  0xee   : > { %v491_v6 = vpop.f32.mrf.mxu0 }
  0xef   : > { %v540_v7 = vpack.c.bf16 %v527_v4, %v526_v3  ;;  %v492_v10 = vadd.f32 %v1163_v44, %v491_v6  ;;  %v532_v19 = vmax.f32 %v500_v12, 0.0  ;;  %1394 = vmatpush3.bf16.msra.mxu1 %v1430_v38 }
  0xf0   : > { %v1284_v9 = vpop.f32.mrf.mxu0  ;;  %1387 = vmatprep.subr.bf16.mxu1 %v1431_v39 }
  0xf1   : > { %v503_v11 = vadd.f32 %v1284_v9, %v1163_v44  ;;  %1309 = vmatprep.mubr.bf16.mxu1 %v540_v7  ;;  %v530_v17 = vmax.f32 %v492_v10, 0.0 }
  0xf2   : > { %v494_v13 = vpop.f32.mrf.mxu0  ;;  %1310 = vmatmul.mubr.bf16.gmra.mxu1 %v541_v8 }
  0xf3   : > { %v495_v14 = vadd.f32 %v1163_v44, %v494_v13  ;;  %v533_v15 = vmax.f32 %v503_v11, 0.0  ;;  %1395 = vmatpush3.bf16.msra.mxu1 %v1431_v39 }
  0xf4   : > { %v1287_v16 = vpop.f32.mrf.mxu0  ;;  %1388 = vmatprep.subr.bf16.mxu1 %v1432_v40 }
  0xf5   : > { %v531_v18 = vmax.f32 %v495_v14, 0.0  ;;  %v543_v22 = vpack.c.bf16 %v533_v15, %v532_v19  ;;  %v516_v26 = vadd.f32 %v1287_v16, %v1163_v44  ;;  %v1434_v19 = vld [vmem:[%s1682_s7 + $0x10] sm:$0xff]  }
  0xf6   : > { %v507_v20 = vpop.f32.mrf.mxu0 }
  0xf7   : > { %v542_v21 = vpack.c.bf16 %v531_v18, %v530_v17  ;;  %v508_v24 = vadd.f32 %v1163_v44, %v507_v20  ;;  %v536_v32 = vmax.f32 %v516_v26, 0.0  ;;  %1396 = vmatpush3.bf16.msra.mxu1 %v1432_v40  ;;  %v1435_v20 = vld [vmem:[%s1682_s7 + $0x8] sm:$0xff]  }
  0xf8   : > { %v1288_v23 = vpop.f32.mrf.mxu0  ;;  %1389 = vmatprep.subr.bf16.mxu1 %v1433_v41 }
  0xf9   : > { %v519_v25 = vadd.f32 %v1288_v23, %v1163_v44  ;;  %1313 = vmatprep.mubr.bf16.mxu1 %v542_v21  ;;  %v534_v30 = vmax.f32 %v508_v24, 0.0  ;;  %v1436_v21 = vld [vmem:[%s1682_s7] sm:$0xff]  }
  0xfa   : > { %v510_v27 = vpop.f32.mrf.mxu0  ;;  %1314 = vmatmul.mubr.bf16.gmra.mxu1 %v543_v22  ;;  %v1185_v24 = vld [vmem:[%s1681_s6] ss:$0 sm:$0xff] }
  0xfb   : > { %v511_v28 = vadd.f32 %v1163_v44, %v510_v27  ;;  %v537_v29 = vmax.f32 %v519_v25, 0.0  ;;  %1397 = vmatpush3.bf16.msra.mxu1 %v1433_v41 }
  0xfc   : > { %1390 = vmatprep.subr.bf16.mxu1 %v1434_v19 }
  0xfd   : > { %v535_v31 = vmax.f32 %v511_v28, 0.0  ;;  %v545_v34 = vpack.c.bf16 %v537_v29, %v536_v32 }
  0xff   : > { %v544_v33 = vpack.c.bf16 %v535_v31, %v534_v30  ;;  %1398 = vmatpush3.bf16.msra.mxu1 %v1434_v19 }
 0x100   : > { %1391 = vmatprep.subr.bf16.mxu1 %v1435_v20 }
 0x101   : > { %1317 = vmatprep.mubr.bf16.mxu1 %v544_v33 }
 0x102   : > { %1318 = vmatmul.mubr.bf16.gmra.mxu1 %v545_v34 }
 0x103   : > { %1399 = vmatpush3.bf16.msra.mxu1 %v1435_v20 }
 0x104   : > { %1392 = vmatprep.subr.bf16.mxu1 %v1436_v21 }
 0x107   : > { %1400 = vmatpush3.bf16.msra.mxu1 %v1436_v21 }
 0x1aa   : > { %v1307_v42 = vpop.f32.mrf.mxu1 }
 0x1ab   : > { %v660_v50 = vadd.f32 %v1307_v42, %v1176_v45 }
 0x1ac   : > { %v651_v43 = vpop.f32.mrf.mxu1 }
 0x1ad   : > { %v652_v48 = vadd.f32 %v1176_v45, %v651_v43 }
 0x1ae   : > { %v1308_v44 = vpop.f32.mrf.mxu1 }
 0x1af   : > { %v663_v46 = vadd.f32 %v1308_v44, %v1176_v45 }
 0x1b0   : > { %v654_v47 = vpop.f32.mrf.mxu1 }
 0x1b1   : > { %v655_v49 = vadd.f32 %v1176_v45, %v654_v47  ;;  %v715_v53 = vpack.c.bf16 %v663_v46, %v660_v50 }
 0x1b2   : > { %v1311_v51 = vpop.f32.mrf.mxu1 }
 0x1b3   : > { %v714_v52 = vpack.c.bf16 %v655_v49, %v652_v48  ;;  %v676_v60 = vadd.f32 %v1311_v51, %v1176_v45 }
 0x1b4   : > { %v667_v54 = vpop.f32.mrf.mxu1 }
 0x1b5   : > { %1337 = vmatprep.mubr.bf16.mxu0 %v714_v52  ;;  %v668_v58 = vadd.f32 %v1176_v45, %v667_v54 }
 0x1b6   : > { %v1312_v55 = vpop.f32.mrf.mxu1  ;;  %1338 = vmatmul.mubr.bf16.vlgmr.msra.gmra.mxu0 %v715_v53 }
 0x1b7   : > { %1354 = vmatpush3.bf16.msra.mxu0 %v1429_v37  ;;  %v679_v56 = vadd.f32 %v1312_v55, %v1176_v45 }
 0x1b8   : > { %v670_v57 = vpop.f32.mrf.mxu1  ;;  %1355 = vmatprep.subr.bf16.mxu0 %v1430_v38 }
 0x1b9   : > { %v671_v59 = vadd.f32 %v1176_v45, %v670_v57  ;;  %v717_v63 = vpack.c.bf16 %v679_v56, %v676_v60 }
 0x1ba   : > { %v1315_v61 = vpop.f32.mrf.mxu1 }
 0x1bb   : > { %v716_v62 = vpack.c.bf16 %v671_v59, %v668_v58  ;;  %1356 = vmatpush3.bf16.msra.mxu0 %v1430_v38  ;;  %v692_v6 = vadd.f32 %v1315_v61, %v1176_v45 }
 0x1bc   : > { %v683_v0 = vpop.f32.mrf.mxu1  ;;  %1357 = vmatprep.subr.bf16.mxu0 %v1431_v39 }
 0x1bd   : > { %1341 = vmatprep.mubr.bf16.mxu0 %v716_v62  ;;  %v684_v4 = vadd.f32 %v1176_v45, %v683_v0 }
 0x1be   : > { %v1316_v1 = vpop.f32.mrf.mxu1  ;;  %1342 = vmatmul.mubr.bf16.gmra.mxu0 %v717_v63 }
 0x1bf   : > { %1358 = vmatpush3.bf16.msra.mxu0 %v1431_v39  ;;  %v695_v2 = vadd.f32 %v1316_v1, %v1176_v45 }
 0x1c0   : > { %v686_v3 = vpop.f32.mrf.mxu1  ;;  %1359 = vmatprep.subr.bf16.mxu0 %v1432_v40 }
 0x1c1   : > { %v687_v5 = vadd.f32 %v1176_v45, %v686_v3  ;;  %v719_v9 = vpack.c.bf16 %v695_v2, %v692_v6 }
 0x1c2   : > { %v1319_v7 = vpop.f32.mrf.mxu1 }
 0x1c3   : > { %v718_v8 = vpack.c.bf16 %v687_v5, %v684_v4  ;;  %1360 = vmatpush3.bf16.msra.mxu0 %v1432_v40  ;;  %v708_v16 = vadd.f32 %v1319_v7, %v1176_v45 }
 0x1c4   : > { %v699_v10 = vpop.f32.mrf.mxu1  ;;  %1361 = vmatprep.subr.bf16.mxu0 %v1433_v41 }
 0x1c5   : > { %1345 = vmatprep.mubr.bf16.mxu0 %v718_v8  ;;  %v700_v14 = vadd.f32 %v1176_v45, %v699_v10 }
 0x1c6   : > { %v1320_v11 = vpop.f32.mrf.mxu1  ;;  %1346 = vmatmul.mubr.bf16.gmra.mxu0 %v719_v9 }
 0x1c7   : > { %1362 = vmatpush3.bf16.msra.mxu0 %v1433_v41  ;;  %v711_v12 = vadd.f32 %v1320_v11, %v1176_v45 }
 0x1c8   : > { %v702_v13 = vpop.f32.mrf.mxu1  ;;  %1363 = vmatprep.subr.bf16.mxu0 %v1434_v19 }
 0x1c9   : > { %v703_v15 = vadd.f32 %v1176_v45, %v702_v13  ;;  %v721_v18 = vpack.c.bf16 %v711_v12, %v708_v16 }
 0x1cb   : > { %v720_v17 = vpack.c.bf16 %v703_v15, %v700_v14  ;;  %1364 = vmatpush3.bf16.msra.mxu0 %v1434_v19  ;;  %v1194_v15 = vld [vmem:[%s1683_s8] ss:$0 sm:$0xff] }
 0x1cc   : > { %1365 = vmatprep.subr.bf16.mxu0 %v1435_v20 }
 0x1cd   : > { %1349 = vmatprep.mubr.bf16.mxu0 %v720_v17 }
 0x1ce   : > { %1350 = vmatmul.mubr.bf16.gmra.mxu0 %v721_v18 }
 0x1cf   : > { %1366 = vmatpush3.bf16.msra.mxu0 %v1435_v20 }
 0x1d0   : > { %1367 = vmatprep.subr.bf16.mxu0 %v1436_v21 }
 0x1d3   : > { %1368 = vmatpush3.bf16.msra.mxu0 %v1436_v21 }
 0x276   : > { %v1339_v22 = vpop.f32.mrf.mxu0 }
 0x277   : > { %v836_v28 = vadd.f32 %v1339_v22, %v1185_v24 }
 0x278   : > { %v827_v23 = vpop.f32.mrf.mxu0 }
 0x279   : > { %v828_v26 = vadd.f32 %v1185_v24, %v827_v23  ;;  %v892_v35 = vmax.f32 %v836_v28, 0.0 }
 0x27a   : > { %v1340_v25 = vpop.f32.mrf.mxu0 }
 0x27b   : > { %v839_v27 = vadd.f32 %v1340_v25, %v1185_v24  ;;  %v890_v33 = vmax.f32 %v828_v26, 0.0 }
 0x27c   : > { %v830_v29 = vpop.f32.mrf.mxu0 }
 0x27d   : > { %v831_v30 = vadd.f32 %v1185_v24, %v830_v29  ;;  %v893_v31 = vmax.f32 %v839_v27, 0.0 }
 0x27e   : > { %v1343_v32 = vpop.f32.mrf.mxu0 }
 0x27f   : > { %v891_v34 = vmax.f32 %v831_v30, 0.0  ;;  %v907_v38 = vpack.c.bf16 %v893_v31, %v892_v35  ;;  %v852_v42 = vadd.f32 %v1343_v32, %v1185_v24 }
 0x280   : > { %v843_v36 = vpop.f32.mrf.mxu0 }
 0x281   : > { %v906_v37 = vpack.c.bf16 %v891_v34, %v890_v33  ;;  %v844_v40 = vadd.f32 %v1185_v24, %v843_v36  ;;  %v896_v49 = vmax.f32 %v852_v42, 0.0 }
 0x282   : > { %v1344_v39 = vpop.f32.mrf.mxu0 }
 0x283   : > { %v855_v41 = vadd.f32 %v1344_v39, %v1185_v24  ;;  %1369 = vmatprep.mubr.bf16.mxu0 %v906_v37  ;;  %v894_v47 = vmax.f32 %v844_v40, 0.0 }
 0x284   : > { %v846_v43 = vpop.f32.mrf.mxu0  ;;  %1370 = vmatmul.mubr.bf16.vlgmr.msra.gmra.mxu0 %v907_v38 }
 0x285   : > { %v847_v44 = vadd.f32 %v1185_v24, %v846_v43  ;;  %v897_v45 = vmax.f32 %v855_v41, 0.0 }
 0x286   : > { %v1347_v46 = vpop.f32.mrf.mxu0 }
 0x287   : > { %v895_v48 = vmax.f32 %v847_v44, 0.0  ;;  %v909_v52 = vpack.c.bf16 %v897_v45, %v896_v49  ;;  %v868_v56 = vadd.f32 %v1347_v46, %v1185_v24 }
 0x288   : > { %v859_v50 = vpop.f32.mrf.mxu0 }
 0x289   : > { %v908_v51 = vpack.c.bf16 %v895_v48, %v894_v47  ;;  %v860_v54 = vadd.f32 %v1185_v24, %v859_v50  ;;  %v900_v63 = vmax.f32 %v868_v56, 0.0 }
 0x28a   : > { %v1348_v53 = vpop.f32.mrf.mxu0 }
 0x28b   : > { %v871_v55 = vadd.f32 %v1348_v53, %v1185_v24  ;;  %1373 = vmatprep.mubr.bf16.mxu1 %v908_v51  ;;  %v898_v61 = vmax.f32 %v860_v54, 0.0 }
 0x28c   : > { %v862_v57 = vpop.f32.mrf.mxu0  ;;  %1374 = vmatmul.mubr.bf16.vlgmr.msra.gmra.mxu1 %v909_v52 }
 0x28d   : > { %v863_v58 = vadd.f32 %v1185_v24, %v862_v57  ;;  %v901_v59 = vmax.f32 %v871_v55, 0.0 }
 0x28e   : > { %v1351_v60 = vpop.f32.mrf.mxu0 }
 0x28f   : > { %v899_v62 = vmax.f32 %v863_v58, 0.0  ;;  %v911_v2 = vpack.c.bf16 %v901_v59, %v900_v63  ;;  %v884_v6 = vadd.f32 %v1351_v60, %v1185_v24 }
 0x290   : > { %v875_v0 = vpop.f32.mrf.mxu0 }
 0x291   : > { %v910_v1 = vpack.c.bf16 %v899_v62, %v898_v61  ;;  %v876_v4 = vadd.f32 %v1185_v24, %v875_v0  ;;  %v904_v12 = vmax.f32 %v884_v6, 0.0 }
 0x292   : > { %v1352_v3 = vpop.f32.mrf.mxu0 }
 0x293   : > { %v887_v5 = vadd.f32 %v1352_v3, %v1185_v24  ;;  %1377 = vmatprep.mubr.bf16.mxu1 %v910_v1  ;;  %v902_v10 = vmax.f32 %v876_v4, 0.0 }
 0x294   : > { %v878_v7 = vpop.f32.mrf.mxu0  ;;  %1378 = vmatmul.mubr.bf16.gmra.mxu1 %v911_v2 }
 0x295   : > { %v879_v8 = vadd.f32 %v1185_v24, %v878_v7  ;;  %v905_v9 = vmax.f32 %v887_v5, 0.0 }
 0x297   : > { %v903_v11 = vmax.f32 %v879_v8, 0.0  ;;  %v913_v14 = vpack.c.bf16 %v905_v9, %v904_v12 }
 0x299   : > { %v912_v13 = vpack.c.bf16 %v903_v11, %v902_v10 }
 0x29b   : > { %1381 = vmatprep.mubr.bf16.mxu1 %v912_v13 }
 0x29c   : > { %1382 = vmatmul.mubr.bf16.gmra.mxu1 %v913_v14 }
 0x344   : > { %v1371_v16 = vpop.f32.mrf.mxu0 }
 0x345   : > { %v1028_v17 = vadd.f32 %v1371_v16, %v1194_v15 }
 0x346   : > { %v1019_v18 = vpop.f32.mrf.mxu0 }
 0x347   : > { %1084 = vst.msk [vmem:[%s1638_s28 + $0x10] sm:$0xff] %vm400_vm0, %v1028_v17  ;;  %v1020_v19 = vadd.f32 %v1194_v15, %v1019_v18 }
 0x348   : > { %v1372_v20 = vpop.f32.mrf.mxu0 }
 0x349   : > { %1082 = vst.msk [vmem:[%s1638_s28] sm:$0xff] %vm400_vm0, %v1020_v19  ;;  %v1031_v21 = vadd.f32 %v1372_v20, %v1194_v15 }
 0x34a   : > { %v1022_v22 = vpop.f32.mrf.mxu0 }
 0x34b   : > { %1085 = vst.msk [vmem:[%s1638_s28 + $0x18] sm:$0xff] %vm400_vm0, %v1031_v21  ;;  %v1023_v23 = vadd.f32 %v1194_v15, %v1022_v22 }
 0x34c   : > { %v1375_v24 = vpop.f32.mrf.mxu1 }
 0x34d   : > { %1083 = vst.msk [vmem:[%s1638_s28 + $0x8] sm:$0xff] %vm400_vm0, %v1023_v23  ;;  %v1044_v25 = vadd.f32 %v1375_v24, %v1194_v15 }
 0x34e   : > { %v1035_v26 = vpop.f32.mrf.mxu1 }
 0x34f   : > { %1088 = vst.msk [vmem:[%s1638_s28 + $0x30] sm:$0xff] %vm400_vm0, %v1044_v25  ;;  %v1036_v27 = vadd.f32 %v1194_v15, %v1035_v26 }
 0x350   : > { %v1376_v28 = vpop.f32.mrf.mxu1 }
 0x351   : > { %1086 = vst.msk [vmem:[%s1638_s28 + $0x20] sm:$0xff] %vm400_vm0, %v1036_v27  ;;  %v1047_v29 = vadd.f32 %v1376_v28, %v1194_v15 }
 0x352   : > { %v1038_v30 = vpop.f32.mrf.mxu1 }
 0x353   : > { %1089 = vst.msk [vmem:[%s1638_s28 + $0x38] sm:$0xff] %vm400_vm0, %v1047_v29  ;;  %v1039_v31 = vadd.f32 %v1194_v15, %v1038_v30 }
 0x354   : > { %v1379_v32 = vpop.f32.mrf.mxu1 }
 0x355   : > { %1087 = vst.msk [vmem:[%s1638_s28 + $0x28] sm:$0xff] %vm400_vm0, %v1039_v31  ;;  %v1060_v33 = vadd.f32 %v1379_v32, %v1194_v15 }
 0x356   : > { %v1051_v34 = vpop.f32.mrf.mxu1 }
 0x357   : > { %1092 = vst.msk [vmem:[%s1638_s28 + $0x50] sm:$0xff] %vm400_vm0, %v1060_v33  ;;  %v1052_v35 = vadd.f32 %v1194_v15, %v1051_v34 }
 0x358   : > { %v1380_v36 = vpop.f32.mrf.mxu1 }
 0x359   : > { %1090 = vst.msk [vmem:[%s1638_s28 + $0x40] sm:$0xff] %vm400_vm0, %v1052_v35  ;;  %v1063_v37 = vadd.f32 %v1380_v36, %v1194_v15 }
 0x35a   : > { %v1054_v38 = vpop.f32.mrf.mxu1 }
 0x35b   : > { %1093 = vst.msk [vmem:[%s1638_s28 + $0x58] sm:$0xff] %vm400_vm0, %v1063_v37  ;;  %v1055_v39 = vadd.f32 %v1194_v15, %v1054_v38 }
 0x35c   : > { %v1383_v40 = vpop.f32.mrf.mxu1 }
 0x35d   : > { %1091 = vst.msk [vmem:[%s1638_s28 + $0x48] sm:$0xff] %vm400_vm0, %v1055_v39  ;;  %v1076_v41 = vadd.f32 %v1383_v40, %v1194_v15 }
 0x35e   : > { %v1067_v42 = vpop.f32.mrf.mxu1 }
 0x35f   : > { %1096 = vst.msk [vmem:[%s1638_s28 + $0x70] sm:$0xff] %vm400_vm0, %v1076_v41  ;;  %v1068_v43 = vadd.f32 %v1194_v15, %v1067_v42 }
 0x360   : > { %v1384_v44 = vpop.f32.mrf.mxu1 }
 0x361   : > { %1094 = vst.msk [vmem:[%s1638_s28 + $0x60] sm:$0xff] %vm400_vm0, %v1068_v43  ;;  %v1079_v45 = vadd.f32 %v1384_v44, %v1194_v15 }
 0x362   : > { %v1070_v46 = vpop.f32.mrf.mxu1 }
 0x363   : > { %1097 = vst.msk [vmem:[%s1638_s28 + $0x78] sm:$0xff] %vm400_vm0, %v1079_v45  ;;  %v1071_v47 = vadd.f32 %v1194_v15, %v1070_v46 }
 0x365   : > { %1095 = vst.msk [vmem:[%s1638_s28 + $0x68] sm:$0xff] %vm400_vm0, %v1071_v47 }
 0x366 PF: > { %s19_s30 = sadd.s32 1, %s1443_s30  }
 0x367   : > { %p16_p4 = scmp.ge.s32.totalorder %s19_s30, 4  }
 0x369   :  { %18 = sbr.rel (!%p16_p4) target bundleno = 1 (0x1), region = 86 }

</bundles_post_ra>
